<compile_context>
chip_gen: v6e
topology: v6e:2x2x1
jax: 0.10.0
libtpu: 0.0.40
codegen_flags: <defaults>
</compile_context>

<pallas_src>
import jax
import jax.numpy as jnp
from jax.experimental import pallas as pl
from jax.experimental.pallas import tpu as pltpu


def attention_kernel(h_ref, wne_ref, node_ref, wlt_ref, b_ref, out_ref):
    # h_ref:    (tm, H)   rows of flattened (B*S, H) hidden (MXU dtype)
    # wne_ref:  (H, N)    = weight @ node_embed.T   (hoisted in wrapper)
    # node_ref: (N, H)    node_embed
    # wlt_ref:  (2H, H)   = Linear.weight.T  (fused output projection)
    # b_ref:    (1, H)    bias (f32)
    # out_ref:  (tm, H)
    h = h_ref[...]

    # attn_score = h @ (W @ ne.T)  -- single MXU matmul, f32 accumulation.
    score = jnp.dot(h, wne_ref[...], preferred_element_type=jnp.float32)   # (tm, N)

    # Softmax over the node axis (dim=2 in torch), all math in f32.
    # Exact division: the approx EUP reciprocal broke the f32 reference check.
    m = jnp.max(score, axis=-1, keepdims=True)
    e = jnp.exp(score - m)
    p = e / jnp.sum(e, axis=-1, keepdims=True)                              # (tm, N)

    # attn_node = p @ node_embed
    attn_node = jnp.dot(p.astype(node_ref.dtype), node_ref[...],
                        preferred_element_type=jnp.float32)                 # (tm, H)

    # Linear(cat([h, attn_node], -1)) as one 2H-deep contraction:
    #   cat (tm, 2H) @ lin_w.T (2H, H) + b
    cat = jnp.concatenate([h, attn_node.astype(h.dtype)], axis=-1)          # (tm, 2H)
    out = jnp.dot(cat, wlt_ref[...], preferred_element_type=jnp.float32) + b_ref[...]
    out_ref[...] = out.astype(out_ref.dtype)


def attention_forward(node_embed, hidden, weight, lin_w, lin_b,
                      *, mxu_dtype=None, block_m=None,
                      single_buffer_weights=False):
    """node_embed: (N,H)  hidden: (B,S,H)  weight: (H,H)
       lin_w: (H, 2H)  lin_b: (H,)  ->  (B,S,H)

       mxu_dtype: dtype for MXU operands; defaults to bf16 when inputs are f32
                  (accumulation and softmax math are always f32).
       single_buffer_weights: v7x VMEM saver — single-buffer the grid-invariant
                  operands (their index_map never changes).
    """
    B, S, H = hidden.shape
    N = node_embed.shape[0]
    M = B * S
    out_dtype = hidden.dtype

    if mxu_dtype is None:
        mxu_dtype = jnp.bfloat16 if hidden.dtype == jnp.float32 else hidden.dtype

    # Hoist the weight/node product: (h @ W) @ ne.T == h @ (W @ ne.T).
    w_ne = jnp.dot(weight, node_embed.T).astype(mxu_dtype)       # (H, N)
    ne   = node_embed.astype(mxu_dtype)                          # (N, H)
    wlt  = lin_w.T.astype(mxu_dtype)                             # (2H, H)
    b2d  = lin_b.reshape(1, H).astype(jnp.float32)               # (1, H)
    h2d  = hidden.reshape(M, H).astype(mxu_dtype)                # (B*S, H)

    # Row tiling: cap at 128 rows (bounds the (block_m, N) f32 softmax
    # intermediates within v7x's 64 MiB VMEM) and aim for >=2 tiles so the
    # "parallel" axis can shard across both v7x TensorCores. 8-row granule.
    if block_m is None:
        target = min(128, pl.cdiv(M, 2))
        block_m = min(M, max(8, ((target + 7) // 8) * 8))
    grid = (pl.cdiv(M, block_m),)

    const_kwargs = {}
    if single_buffer_weights:
        # Constant index_map => one buffer suffices; halves resident weight
        # VMEM at production N on v7x (64 MiB physical / 32 MiB scoped default).
        const_kwargs = dict(pipeline_mode=pl.Buffered(1))

    grid_spec = pltpu.PrefetchScalarGridSpec(
        num_scalar_prefetch=0,
        grid=grid,
        in_specs=[
            pl.BlockSpec((block_m, H), lambda i: (i, 0)),                 # hidden rows
            pl.BlockSpec((H, N), lambda i: (0, 0), **const_kwargs),       # W @ ne.T
            pl.BlockSpec((N, H), lambda i: (0, 0), **const_kwargs),       # node_embed
            pl.BlockSpec((2 * H, H), lambda i: (0, 0), **const_kwargs),   # lin_w.T
            pl.BlockSpec((1, H), lambda i: (0, 0), **const_kwargs),       # bias
        ],
        out_specs=pl.BlockSpec((block_m, H), lambda i: (i, 0)),
    )

    out2d = pl.pallas_call(
        attention_kernel,
        out_shape=jax.ShapeDtypeStruct((M, H), out_dtype),
        grid_spec=grid_spec,
        compiler_params=pltpu.CompilerParams(
            dimension_semantics=("parallel",)),
    )(h2d, w_ne, ne, wlt, b2d)

    return out2d.reshape(B, S, H)


def attention_reference(node_embed, hidden, weight, lin_w, lin_b):
    hp = jax.lax.Precision.HIGHEST
    score = jnp.einsum("bsh,hk->bsk", hidden, weight, precision=hp)
    score = jnp.einsum("bsk,nk->bsn", score, node_embed, precision=hp)
    p = jax.nn.softmax(score, axis=2)
    attn_node = jnp.einsum("bsn,nh->bsh", p, node_embed, precision=hp)
    cat = jnp.concatenate([hidden, attn_node], axis=2)
    return jnp.einsum("bsc,hc->bsh", cat, lin_w, precision=hp) + lin_b


if __name__ == "__main__":
    B, S, N, H = 2, 8, 16, 32   # batch, decode steps, graph nodes, rnn_hidden

    key = jax.random.PRNGKey(0)
    k1, k2, k3, k4, k5 = jax.random.split(key, 5)

    # Moderate-magnitude activations keep the softmax away from hard-argmax
    # saturation so the bf16-operand path stays well inside its tolerance.
    hidden = 0.5 * jax.random.normal(k1, (B, S, H), dtype=jnp.float32)
    node_embed = 0.5 * jax.random.normal(k2, (N, H), dtype=jnp.float32)

    # nn.Parameter (H,H) with kaiming_uniform_ -> U(-sqrt(6/H), sqrt(6/H))
    bound_w = float(jnp.sqrt(6.0 / H))
    weight = jax.random.uniform(k3, (H, H), jnp.float32, -bound_w, bound_w)

    # nn.Linear(2H -> H): weight (H, 2H), bias (H,)
    bound_l = float(1.0 / jnp.sqrt(2.0 * H))
    lin_w = jax.random.uniform(k4, (H, 2 * H), jnp.float32, -bound_l, bound_l)
    lin_b = jax.random.uniform(k5, (H,), jnp.float32, -bound_l, bound_l)

    ref = attention_reference(node_embed, hidden, weight, lin_w, lin_b)

    # Explicit f32 MXU path: tight check.
    out_f32 = attention_forward(node_embed, hidden, weight, lin_w, lin_b,
                                mxu_dtype=jnp.float32)
    out_f32 = jax.block_until_ready(out_f32)
    assert out_f32.shape == (B, S, H)
    assert jnp.allclose(out_f32, ref, atol=5e-3, rtol=5e-3), "f32 mismatch vs reference"

    # Default path: bf16 MXU operands, f32 accumulation/softmax; looser tolerance.
    out = attention_forward(node_embed, hidden, weight, lin_w, lin_b)
    out = jax.block_until_ready(out)
    assert out.shape == (B, S, H)
    assert jnp.allclose(out, ref, atol=5e-2, rtol=5e-2), "bf16 mismatch vs reference"

    print("KERNEL_OK")
</pallas_src>

<mosaic_0001>
module attributes {stable_mosaic.version = 11 : i64} {
  func.func @attention_kernel(%arg0: i32, %arg1: memref<8x32xf32, #tpu.memory_space<vmem>>, %arg2: memref<32x16xf32, #tpu.memory_space<vmem>>, %arg3: memref<16x32xf32, #tpu.memory_space<vmem>>, %arg4: memref<64x32xf32, #tpu.memory_space<vmem>>, %arg5: memref<1x32xf32, #tpu.memory_space<vmem>>, %arg6: memref<8x32xf32, #tpu.memory_space<vmem>>) attributes {dimension_semantics = [#tpu.dimension_semantics<parallel>], iteration_bounds = array<i64: 2>, scalar_prefetch = 0 : i64, scratch_operands = 0 : i64, tpu.core_type = #tpu.core_type<tc>, window_params = [{transform_indices = @transform_0, window_bounds = array<i64: 8, 32>}, {pipeline_mode = #tpu.pipeline_mode<synchronous>, transform_indices = @transform_1, window_bounds = array<i64: 32, 16>}, {pipeline_mode = #tpu.pipeline_mode<synchronous>, transform_indices = @transform_2, window_bounds = array<i64: 16, 32>}, {pipeline_mode = #tpu.pipeline_mode<synchronous>, transform_indices = @transform_3, window_bounds = array<i64: 64, 32>}, {pipeline_mode = #tpu.pipeline_mode<synchronous>, transform_indices = @transform_4, window_bounds = array<i64: 1, 32>}, {transform_indices = @transform_5, window_bounds = array<i64: 8, 32>}]} {
    %c0 = arith.constant 0 : index
    %c0_0 = arith.constant 0 : index
    %0 = vector.load %arg1[%c0, %c0_0] : memref<8x32xf32, #tpu.memory_space<vmem>>, vector<8x32xf32>
    %c0_1 = arith.constant 0 : index
    %c0_2 = arith.constant 0 : index
    %1 = vector.load %arg2[%c0_1, %c0_2] : memref<32x16xf32, #tpu.memory_space<vmem>>, vector<32x16xf32>
    %cst = arith.constant dense<0.000000e+00> : vector<8x16xf32>
    %2 = tpu.matmul %0, %1, %cst {dimension_numbers = #tpu.dot_dimension_numbers<[1], [0], [0], [1], [0, 0, 1, 1], [], []>} : vector<8x32xf32>, vector<32x16xf32>, vector<8x16xf32> -> vector<8x16xf32>
    %cst_3 = arith.constant dense<0xFF800000> : vector<8xf32>
    %3 = vector.multi_reduction <maximumf>, %2, %cst_3 [1] : vector<8x16xf32> to vector<8xf32>
    %4 = vector.shape_cast %3 : vector<8xf32> to vector<8x1xf32>
    %5 = vector.broadcast %4 : vector<8x1xf32> to vector<8x16xf32>
    %6 = arith.subf %2, %5 : vector<8x16xf32>
    %7 = math.exp %6 : vector<8x16xf32>
    %cst_4 = arith.constant dense<0.000000e+00> : vector<8xf32>
    %8 = vector.multi_reduction <add>, %7, %cst_4 [1] : vector<8x16xf32> to vector<8xf32>
    %9 = vector.shape_cast %8 : vector<8xf32> to vector<8x1xf32>
    %10 = vector.broadcast %9 : vector<8x1xf32> to vector<8x16xf32>
    %11 = arith.divf %7, %10 : vector<8x16xf32>
    %c0_5 = arith.constant 0 : index
    %c0_6 = arith.constant 0 : index
    %12 = vector.load %arg3[%c0_5, %c0_6] : memref<16x32xf32, #tpu.memory_space<vmem>>, vector<16x32xf32>
    %cst_7 = arith.constant dense<0.000000e+00> : vector<8x32xf32>
    %13 = tpu.matmul %11, %12, %cst_7 {dimension_numbers = #tpu.dot_dimension_numbers<[1], [0], [0], [1], [0, 0, 1, 1], [], []>} : vector<8x16xf32>, vector<16x32xf32>, vector<8x32xf32> -> vector<8x32xf32>
    %14 = tpu.concatenate %0, %13 in 1 : vector<8x32xf32>, vector<8x32xf32> -> vector<8x64xf32>
    %c0_8 = arith.constant 0 : index
    %c0_9 = arith.constant 0 : index
    %15 = vector.load %arg4[%c0_8, %c0_9] : memref<64x32xf32, #tpu.memory_space<vmem>>, vector<64x32xf32>
    %cst_10 = arith.constant dense<0.000000e+00> : vector<8x32xf32>
    %16 = tpu.matmul %14, %15, %cst_10 {dimension_numbers = #tpu.dot_dimension_numbers<[1], [0], [0], [1], [0, 0, 1, 1], [], []>} : vector<8x64xf32>, vector<64x32xf32>, vector<8x32xf32> -> vector<8x32xf32>
    %c0_11 = arith.constant 0 : index
    %c0_12 = arith.constant 0 : index
    %17 = vector.load %arg5[%c0_11, %c0_12] : memref<1x32xf32, #tpu.memory_space<vmem>>, vector<1x32xf32>
    %18 = vector.broadcast %17 : vector<1x32xf32> to vector<8x32xf32>
    %19 = arith.addf %16, %18 : vector<8x32xf32>
    %c0_13 = arith.constant 0 : index
    %c0_14 = arith.constant 0 : index
    %20 = vector.load %arg6[%c0_13, %c0_14] : memref<8x32xf32, #tpu.memory_space<vmem>>, vector<8x32xf32>
    tpu.vector_store %arg6[%c0_13, %c0_14], %19 {strides = array<i32>} : memref<8x32xf32, #tpu.memory_space<vmem>>, vector<8x32xf32>,
    return
  }
  func.func @transform_0(%arg0: i32) -> (i32, i32) {
    %c0_i32 = arith.constant 0 : i32
    %c0_i32_0 = arith.constant 0 : i32
    return %arg0, %c0_i32 : i32, i32
  }
  func.func @transform_1(%arg0: i32) -> (i32, i32) {
    %c0_i32 = arith.constant 0 : i32
    %c0_i32_0 = arith.constant 0 : i32
    %c0_i32_1 = arith.constant 0 : i32
    return %c0_i32, %c0_i32_0 : i32, i32
  }
  func.func @transform_2(%arg0: i32) -> (i32, i32) {
    %c0_i32 = arith.constant 0 : i32
    %c0_i32_0 = arith.constant 0 : i32
    %c0_i32_1 = arith.constant 0 : i32
    return %c0_i32, %c0_i32_0 : i32, i32
  }
  func.func @transform_3(%arg0: i32) -> (i32, i32) {
    %c0_i32 = arith.constant 0 : i32
    %c0_i32_0 = arith.constant 0 : i32
    %c0_i32_1 = arith.constant 0 : i32
    return %c0_i32, %c0_i32_0 : i32, i32
  }
  func.func @transform_4(%arg0: i32) -> (i32, i32) {
    %c0_i32 = arith.constant 0 : i32
    %c0_i32_0 = arith.constant 0 : i32
    %c0_i32_1 = arith.constant 0 : i32
    return %c0_i32, %c0_i32_0 : i32, i32
  }
  func.func @transform_5(%arg0: i32) -> (i32, i32) {
    %c0_i32 = arith.constant 0 : i32
    %c0_i32_0 = arith.constant 0 : i32
    return %arg0, %c0_i32 : i32, i32
  }
}

</mosaic_0001>

<bundles_post_ra>
// kernel: tpu_custom_call.1
= control target key start
LH: loop header
LB: loop body
LE: loop exit
PB: predicated region body
PF: predicated region fallthrough
CT: control target
= control target key end

     0   :  { %10 = vsyncpa [#allocation3], 0  ;;  %s928_s0 = inlined_call_operand.vmem [shape: f32[16,32], index: 0, kind: input, shape index: {}]   ;;  %s929_s1 = inlined_call_operand.vmem [shape: f32[32,16], index: 1, kind: input, shape index: {}]   ;;  %s930_s2 = inlined_call_operand.vmem [shape: f32[16,32], index: 2, kind: input, shape index: {}]   ;;  %s931_s3 = inlined_call_operand.vmem [shape: f32[64,32], index: 3, kind: input, shape index: {}]   ;;  %s932_s4 = inlined_call_operand.vmem [shape: f32[1,32], index: 4, kind: input, shape index: {}]   ;;  %s933_s5 = inlined_call_operand.hbm [shape: f32[16,32], index: 5, kind: output, shape index: {}]  }
   0x1   :  { %12 = vsyncpa [#allocation3 + $0x1], 0  ;;  %s764_s18 = smov 0   ;;  %s766_s19 = smov 0  }
   0x2   :  { %s768_s20 = smov 0   ;;  %s770_s21 = smov 0  }
   0x3 LB: > { %s785_s22 = sadd.s32 4294967295, %s728_s21   ;;  %s554_s23 = sadd.s32 4294967294, %s728_s21   ;;  %s728_s21 = sphi %s770_s21, %s939_s21   ;;  %s724_s20 = sphi %s768_s20, %s938_s20   ;;  %s720_s19 = sphi %s766_s19, %s937_s19   ;;  %s716_s18 = sphi %s764_s18, %s936_s18  }
   0x4   : > { %s789_s24 = sadd.s32 1, %s728_s21   ;;  %s135_s25 = sadd.s32 1, %s724_s20 }
   0x5   : > { %s132_s26 = ssub.s32 %s728_s21, %s789_s24  ;;  %p145_p0 = scmp.ne.s32.totalorder %s724_s20, %s720_s19 }
   0x6   : > { %p133_p1 = scmp.eq.s32.totalorder %s132_s26, 0  ;;  %p146_p2 = scmp.eq.s32.totalorder %s785_s22, 1 }
   0x7   : > { %p151_p3 = scmp.ne.s32.totalorder %s720_s19, %s716_s18  ;;  %p152_p4 = scmp.eq.s32.totalorder %s554_s23, 1 }
   0x8   : > { %s800_s27 = scalar_select %p133_p1, %s724_s20, %s135_s25  }
   0x9   : > { %p802_p5 = por %p146_p2, %p145_p0  ;;  %p806_p6 = por %p152_p4, %p151_p3 }
   0xa   : > { %p557_p7 = scmp.ge.s32.totalorder %s728_s21, 1  ;;  %p189_p8 = scmp.lt.s32.totalorder %s728_s21, 3 }
   0xc   : > { %p190_p9 = pnand %p557_p7, %p189_p8 }
   0xd   : > { %p216_p10 = scmp.lt.s32.totalorder (!%p190_p9), %s785_s22, 1  ;;  %s732_s6 = smov (!%p190_p9), 32  }
   0xe   : > { %193 = sbr.rel (%p190_p9) target bundleno = 1050 (0x41a), region = 40  ;;  %s213_s7 = sand.u32 (!%p190_p9), 1, %s720_s19  }
   0xf   : > { %s558_s8 = sshll.u32 (!%p190_p9), %s213_s7, 3  ;;  %s565_s11 = sshll.u32 (!%p190_p9), %s785_s22, 7 }
  0x10   : > { %s892_s16 = scalar_lea.hbm (!%p190_p9), %s933_s5, %s565_s11 }
  0x13   : > { %v224_v0 = vld [vmem:[%s929_s1 + $0x18] sm:$0xff]  ;;  %v730_v1 = vmov 0.0   ;;  %v223_v2 = vld [vmem:[%s929_s1 + $0x10] sm:$0xff]  ;;  %vm731_vm0 = vmmov 0   ;;  %s217_s9 = scalar_select %p216_p10, %s785_s22, 1  ;;  %v222_v3 = vld [vmem:[%s929_s1 + $0x8] sm:$0xff] }
  0x14   : > { %585 = vmatprep.subr.mxu0 %v730_v1  ;;  %593 = vmatprep.mubr.msk.f32.mxu0 %vm731_vm0, %v730_v1  ;;  %v221_v4 = vld [vmem:[%s929_s1] sm:$0xff]  ;;  %vm225_vm1 = vcmask 261120   ;;  %vm299_vm2 = vcmask 130048   ;;  %v312_v14 = vld [vmem:[%s930_s2 + $0x8] sm:$0xff]  ;;  %v398_v19 = vld [vmem:[%s931_s3 + $0x38] sm:$0xff]  ;;  %vm406_vm3 = vcmask 523264  }
  0x15   : > { %586 = vmatpush3.msra.mxu0 %v224_v0  ;;  %603 = vmatprep.subr.mxu1 %v730_v1  ;;  %s559_s12 = sshll.u32 %s217_s9, 3  ;;  %v311_v15 = vld [vmem:[%s930_s2] sm:$0xff]  ;;  %v397_v20 = vld [vmem:[%s931_s3 + $0x30] sm:$0xff]  ;;  %v396_v21 = vld [vmem:[%s931_s3 + $0x28] sm:$0xff]  ;;  %s733_s22 = smov [#allocation2]  }
  0x16   : > { %587 = vmatprep.subr.mxu0 %v730_v1  ;;  %619 = vmatprep.mubr.msk.f32.mxu1 %vm731_vm0, %v730_v1  ;;  %s219_s17 = scalar_lea.vmem %s928_s0, %s559_s12  ;;  %v395_v22 = vld [vmem:[%s931_s3 + $0x20] sm:$0xff]  ;;  %v394_v23 = vld [vmem:[%s931_s3 + $0x18] sm:$0xff]  ;;  %v393_v24 = vld [vmem:[%s931_s3 + $0x10] sm:$0xff]  ;;  %s215_s12 = scalar_lea.vmem [#allocation2], %s558_s8 }
  0x17   : > { %588 = vmatpush3.msra.mxu0 %v223_v2  ;;  %v220_v5 = vld [vmem:[%s219_s17] sm:$0xff]  ;;  %604 = vmatpush3.msra.mxu1 %v398_v19  ;;  %v392_v25 = vld [vmem:[%s931_s3 + $0x8] sm:$0xff]  ;;  %s495_s13 = sshll.u32 %s215_s12, 4  ;;  %s482_s17 = scalar_lea.sflag [#allocation3], %s213_s7  ;;  %s496_s13 = int_to_ptr.vmem [resolvable:$true] %s495_s13 }
  0x18   : > { %589 = vmatprep.subr.mxu0 %v730_v1  ;;  %605 = vmatprep.subr.mxu1 %v730_v1  ;;  %v391_v26 = vld [vmem:[%s931_s3] sm:$0xff]  ;;  %s668_s23 = scalar_lea.vmem %s496_s13, 128  ;;  %s672_s25 = sshll.u32 %s733_s22, 4  ;;  %s673_s25 = int_to_ptr.vmem [resolvable:$false] %s672_s25 }
  0x19   : > { %590 = vmatpush3.msra.mxu0 %v222_v3  ;;  %606 = vmatpush3.msra.mxu1 %v397_v20  ;;  %v562_v31 = vld [vmem:[%s932_s4] ss:$0 sm:$0xff]  ;;  %p669_p11 = scmp.ne.s32.totalorder %s496_s13, %s668_s23  ;;  %s674_s26 = scalar_lea.vmem %s673_s25, 256 }
  0x1a   : > { %591 = vmatprep.subr.mxu0 %v730_v1  ;;  %607 = vmatprep.subr.mxu1 %v730_v1  ;;  %p675_p0 = scmp.lt.s32.totalorder %s496_s13, %s673_s25  ;;  %p676_p1 = scmp.lt.s32.totalorder %s674_s26, %s668_s23 }
  0x1b   : > { %592 = vmatpush3.msra.mxu0 %v221_v4  ;;  %608 = vmatpush3.msra.mxu1 %v396_v21  ;;  %p670_p12 = pnand %p669_p11, %p802_p5 }
  0x1c   : > { %594 = vmatmul.mubr.msk.f32.vlgmr.msra.gmra.mxu0 %vm225_vm1, %v220_v5  ;;  %596 = vmatprep.subr.mxu0 %v730_v1  ;;  %p677_p2 = por %p676_p1, %p675_p0 }
  0x1d   : > { %600 = vmatprep.mubr.msk.f32.mxu0 %vm731_vm0, %v730_v1  ;;  %597 = vmatpush3.msra.mxu0 %v312_v14  ;;  %p671_p13 = pneg %p670_p12 }
  0x1e   : > { %598 = vmatprep.subr.mxu0 %v730_v1  ;;  %609 = vmatprep.subr.mxu1 %v730_v1 }
  0x1f   : > { %599 = vmatpush3.msra.mxu0 %v311_v15  ;;  %610 = vmatpush3.msra.mxu1 %v395_v22  ;;  %p678_p3 = pnand %p677_p2, %p671_p13 }
  0x20   : > { %611 = vmatprep.subr.mxu1 %v730_v1 }
  0x21   : > { %612 = vmatpush3.msra.mxu1 %v394_v23 }
  0x22   : > { %613 = vmatprep.subr.mxu1 %v730_v1 }
  0x23   : > { %614 = vmatpush3.msra.mxu1 %v393_v24 }
  0x24   : > { %615 = vmatprep.subr.mxu1 %v730_v1 }
  0x25   : > { %616 = vmatpush3.msra.mxu1 %v392_v25 }
  0x26   : > { %617 = vmatprep.subr.mxu1 %v730_v1 }
  0x27   : > { %618 = vmatpush3.msra.mxu1 %v391_v26 }
  0xdc   : > { %v295_v6 = vpop.f32.mrf.mxu0 }
  0xdd   : > { %v300_v7 = vsel %vm299_vm2, %v295_v6, -inf }
  0xde   : > { %301 = vmax.xlane.f32.xlu0 %v300_v7  ;;  %v595_v8 = vpop.f32.mrf.mxu0 }
 0x167   : > { %v302_v9 = vpop.xlane.xlu0 %301 }
 0x168   : > { %v303_v10 = vsub.f32 %v295_v6, %v302_v9 }
 0x16a   : > { %v304_v11 = vmul.f32 1.442695, %v303_v10 }
 0x16c   : > { %664 = vpow2.f32 %v304_v11 }
 0x179   : > { %v665_v12 = vpop.eup %664 }
 0x17a   : > { %v306_v13 = vsel %vm299_vm2, %v665_v12, 0.0 }
 0x17b   : > { %307 = vadd.xlane.f32.xlu0 %v306_v13 }
 0x204   : > { %v308_v16 = vpop.xlane.xlu0 %307 }
 0x205   : > { %666 = vrcp.f32 %v308_v16 }
 0x212   : > { %v667_v17 = vpop.eup %666 }
 0x213   : > { %v310_v18 = vmul.f32 %v667_v17, %v665_v12 }
 0x215   : > { %601 = vmatmul.mubr.msk.f32.vlgmr.msra.gmra.mxu0 %vm299_vm2, %v310_v18 }
 0x2d5   : > { %v382_v27 = vpop.f32.mrf.mxu0 }
 0x2d6   : > { %387 = vrot.lane.b32.xlu1 %v382_v27, %s732_s6 }
 0x2d7   : > { %v602_v28 = vpop.f32.mrf.mxu0 }
 0x348   : > { %v388_v29 = vpop.permute.xlu1 %387 }
 0x349   : > { %v390_v30 = vsel %vm225_vm1, %v220_v5, %v388_v29 }
 0x34a   : > { %620 = vmatmul.mubr.msk.f32.vlgmr.msra.gmra.mxu1 %vm406_vm3, %v390_v30 }
 0x40a   : > { %v476_v32 = vpop.f32.mrf.mxu1 }
 0x40b   : > { %v477_v33 = vadd.f32 %v562_v31, %v476_v32 }
 0x40c   : > { %v621_v34 = vpop.f32.mrf.mxu1 }
 0x40d   : > { %480 = vst.msk [vmem:[%s215_s12] sm:$0xff] %vm225_vm1, %v477_v33 }
 0x40e   : > { %681 = shalt.err (!%p678_p3)
}
 0x40f   : > { %s682_s30 = scalar_lea.hbm %s892_s16, 128  ;;  %s686_s8 = scalar_lea.hbm %s933_s5, 256 }
 0x410   : > { %p683_p4 = scmp.ne.s32.totalorder %s892_s16, %s682_s30  ;;  %p687_p9 = scmp.lt.s32.totalorder %s892_s16, %s933_s5 }
 0x411   : > { %p688_p10 = scmp.lt.s32.totalorder %s686_s8, %s682_s30 }
 0x412   : > { %p684_p7 = pnand %p683_p4, %p802_p5 }
 0x413   : > { %p689_p11 = por %p688_p10, %p687_p9 }
 0x414   : > { %p685_p8 = pneg %p684_p7 }
 0x416   : > { %p690_p12 = pnand %p689_p11, %p685_p8 }
 0x418   : > { %693 = shalt.err (!%p690_p12)
}
 0x419   : > { %622 = dma.vmem_to_hbm [thread:$0]  (%p802_p5), %s496_s13, 128, %s892_s16, %s482_s17  }
 0x41a PF: > { %p628_p13 = scmp.ge.s32.totalorder %s728_s21, 2  ;;  %s507_s11 = sand.u32 1, %s716_s18  }
 0x41b   : > { %s508_s12 = scalar_lea.sflag [#allocation3], %s507_s11 }
 0x41c   : > { %p625_p0 = pnand %p628_p13, %p806_p6 }
 0x41e   : > { %p626_p1 = pneg %p625_p0 }
 0x420   : > { %711 = dma.done.wait (%p626_p1), %s508_s12, 128  }
 0x421   : > { %713 = vsyncadd (%p626_p1), %s508_s12, 4294967168  ;;  %p15_p2 = scmp.ge.s32.totalorder %s789_s24, 4   ;;  %s936_s18 = smov %s720_s19 }
 0x422   : > { %s937_s19 = smov %s724_s20  ;;  %s938_s20 = smov %s800_s27 }
 0x423   : > { %s939_s21 = smov %s789_s24  ;;  %17 = sbr.rel (!%p15_p2) target bundleno = 3 (0x3), region = 75 }
 0x428   :  { %513 = vsyncpa [#allocation3], 1 }
 0x429   :  { %515 = vsyncpa [#allocation3 + $0x1], 1 }

</bundles_post_ra>
